<compile_context>
chip_gen: v6e
topology: v6e:2x2x1
jax: 0.10.0
libtpu: 0.0.40
codegen_flags: <defaults>
</compile_context>

<pallas_src>
import functools

import jax
import jax.numpy as jnp
from jax.experimental import pallas as pl
from jax.experimental.pallas import tpu as pltpu


def _rmsnorm_kernel(x_ref, scale_ref, o_ref, *, eps, d_orig):
    # x_ref: (tile_rows, d_pad)   scale_ref: (1, d_pad)   o_ref: (tile_rows, d_pad)
    x = x_ref[...].astype(jnp.float32)
    scale = scale_ref[...].astype(jnp.float32)            # (1, d_pad), broadcasts
    # Sum of squares over the (possibly padded) last dim; padded columns are
    # zero so they do not contribute.  Divide by the *original* d.
    ssq = jnp.sum(x * x, axis=-1, keepdims=True)           # (tile_rows, 1)
    inv = jax.lax.rsqrt(ssq * (1.0 / d_orig) + eps)        # EUP rsqrt, one op
    o_ref[...] = (x * inv * scale).astype(o_ref.dtype)


def _round_up(v, m):
    return ((v + m - 1) // m) * m


def rmsnorm(x, scale, eps=1e-05):
    """RMSNorm over the last dim of x (batch, seq, d), scaled by `scale` (d,)."""
    b, s, d = x.shape
    n = b * s
    dtype = x.dtype
    itemsize = jnp.dtype(dtype).itemsize

    # Sublane packing granularity: 8 for 4-byte, 16 for 2-byte, 32 for 1-byte.
    sublane = max(8, 32 // max(itemsize, 1))
    # Lane-dense feature dim.
    d_pad = _round_up(d, 128)

    # Row tile: largest sublane-aligned tile whose double-buffered in+out
    # blocks (2 buffers x (in + out) x tile_rows x d_pad x itemsize) fit a
    # conservative budget that is safe on v5e/v6e (128 MiB) and v7x (64 MiB).
    vmem_block_budget = 24 * 1024 * 1024
    max_rows = max(sublane, vmem_block_budget // (4 * d_pad * itemsize))
    tile_rows = min(1024, (max_rows // sublane) * sublane)
    tile_rows = min(tile_rows, _round_up(n, sublane))
    tile_rows = max(sublane, (tile_rows // sublane) * sublane)

    n_pad = _round_up(n, tile_rows)
    grid = (n_pad // tile_rows,)

    x2d = x.reshape(n, d)
    if (n_pad != n) or (d_pad != d):
        x2d = jnp.pad(x2d, ((0, n_pad - n), (0, d_pad - d)))
    scale2d = scale.reshape(1, d)
    if d_pad != d:
        scale2d = jnp.pad(scale2d, ((0, 0), (0, d_pad - d)))

    cost = pl.CostEstimate(
        flops=3 * n_pad * d_pad,
        transcendentals=n_pad,
        bytes_accessed=(2 * n_pad * d_pad + d_pad) * itemsize,
    )

    out2d = pl.pallas_call(
        functools.partial(_rmsnorm_kernel, eps=eps, d_orig=d),
        out_shape=jax.ShapeDtypeStruct((n_pad, d_pad), dtype),
        grid_spec=pltpu.PrefetchScalarGridSpec(
            num_scalar_prefetch=0,
            grid=grid,
            in_specs=[
                pl.BlockSpec((tile_rows, d_pad), lambda i: (i, 0)),
                pl.BlockSpec((1, d_pad), lambda i: (0, 0)),   # resident, constant block
            ],
            out_specs=pl.BlockSpec((tile_rows, d_pad), lambda i: (i, 0)),
        ),
        compiler_params=pltpu.CompilerParams(
            dimension_semantics=("parallel",),           # lets v7x shard rows over 2 TCs
            vmem_limit_bytes=48 * 1024 * 1024,            # above default scoped, under physical
        ),
        cost_estimate=cost,
    )(x2d, scale2d)

    out2d = out2d[:n, :d]
    return out2d.reshape(b, s, d)


def rmsnorm_ref(x, scale, eps=1e-05):
    norm = jnp.sqrt(jnp.mean(x.astype(jnp.float32) ** 2, axis=-1, keepdims=True) + eps)
    return (x.astype(jnp.float32) / norm * scale.astype(jnp.float32)).astype(x.dtype)


if __name__ == "__main__":
    key = jax.random.PRNGKey(0)
    batch, seq, d = 2, 8, 32
    x = jax.random.normal(key, (batch, seq, d), dtype=jnp.float32)

    # Parameter init matches nn.Parameter(torch.ones(d)).
    scale = jnp.ones((d,), dtype=jnp.float32)

    out = rmsnorm(x, scale, eps=1e-05)
    out = jax.block_until_ready(out)

    ref = rmsnorm_ref(x, scale, eps=1e-05)
    assert out.shape == (batch, seq, d)
    assert jnp.allclose(out, ref, atol=1e-5, rtol=1e-5), "mismatch vs reference"

    print("KERNEL_OK")
</pallas_src>

<mosaic_0001>
module attributes {stable_mosaic.version = 11 : i64} {
  func.func @_rmsnorm_kernel(%arg0: i32, %arg1: memref<16x128xf32, #tpu.memory_space<vmem>>, %arg2: memref<1x128xf32, #tpu.memory_space<vmem>>, %arg3: memref<16x128xf32, #tpu.memory_space<vmem>>) attributes {dimension_semantics = [#tpu.dimension_semantics<parallel>], iteration_bounds = array<i64: 1>, scalar_prefetch = 0 : i64, scratch_operands = 0 : i64, tpu.core_type = #tpu.core_type<tc>, window_params = [{transform_indices = @transform_0, window_bounds = array<i64: 16, 128>}, {pipeline_mode = #tpu.pipeline_mode<synchronous>, transform_indices = @transform_1, window_bounds = array<i64: 1, 128>}, {transform_indices = @transform_2, window_bounds = array<i64: 16, 128>}]} {
    %c0 = arith.constant 0 : index
    %c0_0 = arith.constant 0 : index
    %0 = vector.load %arg1[%c0, %c0_0] : memref<16x128xf32, #tpu.memory_space<vmem>>, vector<16x128xf32>
    %c0_1 = arith.constant 0 : index
    %c0_2 = arith.constant 0 : index
    %1 = vector.load %arg2[%c0_1, %c0_2] : memref<1x128xf32, #tpu.memory_space<vmem>>, vector<1x128xf32>
    %2 = arith.mulf %0, %0 : vector<16x128xf32>
    %cst = arith.constant dense<0.000000e+00> : vector<16xf32>
    %3 = vector.multi_reduction <add>, %2, %cst [1] : vector<16x128xf32> to vector<16xf32>
    %4 = vector.shape_cast %3 : vector<16xf32> to vector<16x1xf32>
    %cst_3 = arith.constant 3.125000e-02 : f32
    %5 = vector.broadcast %cst_3 : f32 to vector<16x1xf32>
    %6 = arith.mulf %4, %5 : vector<16x1xf32>
    %cst_4 = arith.constant 9.99999974E-6 : f32
    %7 = vector.broadcast %cst_4 : f32 to vector<16x1xf32>
    %8 = arith.addf %6, %7 : vector<16x1xf32>
    %9 = math.rsqrt %8 : vector<16x1xf32>
    %10 = vector.broadcast %9 : vector<16x1xf32> to vector<16x128xf32>
    %11 = arith.mulf %0, %10 : vector<16x128xf32>
    %12 = vector.broadcast %1 : vector<1x128xf32> to vector<16x128xf32>
    %13 = arith.mulf %11, %12 : vector<16x128xf32>
    %c0_5 = arith.constant 0 : index
    %c0_6 = arith.constant 0 : index
    %14 = vector.load %arg3[%c0_5, %c0_6] : memref<16x128xf32, #tpu.memory_space<vmem>>, vector<16x128xf32>
    tpu.vector_store %arg3[%c0_5, %c0_6], %13 {strides = array<i32>} : memref<16x128xf32, #tpu.memory_space<vmem>>, vector<16x128xf32>,
    return
  }
  func.func @transform_0(%arg0: i32) -> (i32, i32) {
    %c0_i32 = arith.constant 0 : i32
    %c0_i32_0 = arith.constant 0 : i32
    return %arg0, %c0_i32 : i32, i32
  }
  func.func @transform_1(%arg0: i32) -> (i32, i32) {
    %c0_i32 = arith.constant 0 : i32
    %c0_i32_0 = arith.constant 0 : i32
    %c0_i32_1 = arith.constant 0 : i32
    return %c0_i32, %c0_i32_0 : i32, i32
  }
  func.func @transform_2(%arg0: i32) -> (i32, i32) {
    %c0_i32 = arith.constant 0 : i32
    %c0_i32_0 = arith.constant 0 : i32
    return %arg0, %c0_i32 : i32, i32
  }
}

</mosaic_0001>

<bundles_post_ra>
// kernel: tpu_custom_call.1
= control target key start
LH: loop header
LB: loop body
LE: loop exit
PB: predicated region body
PF: predicated region fallthrough
CT: control target
= control target key end

     0   :  { %7 = vsyncpa [#allocation3], 0  ;;  %s157_s0 = inlined_call_operand.hbm [shape: f32[16,128], index: 0, kind: input, shape index: {}]   ;;  %s158_s1 = inlined_call_operand.vmem [shape: f32[1,128], index: 1, kind: input, shape index: {}]   ;;  %s159_s2 = inlined_call_operand.hbm [shape: f32[16,128], index: 2, kind: output, shape index: {}]  }
   0x1   :  { %8 = vsyncpa [#allocation4], 0  ;;  %s123_s9 = smov [#allocation2]  }
   0x2   :  { %s14_s10 = sshll.u32 %s123_s9, 4  ;;  %s15_s10 = int_to_ptr.vmem [resolvable:$true] %s14_s10 }
   0x3   :  { %s87_s11 = scalar_lea.vmem %s15_s10, 256  ;;  %p92_p1 = scmp.lt.s32.totalorder %s15_s10, %s15_s10 }
   0x4   :  { %p88_p0 = scmp.ne.s32.totalorder %s15_s10, %s87_s11  ;;  %p93_p2 = scmp.lt.s32.totalorder %s87_s11, %s87_s11 }
   0x6   :  { %p94_p3 = por %p93_p2, %p92_p1 }
   0x8   :  { %p95_p4 = pnand %p94_p3, %p88_p0 }
   0xa   :  { %98 = shalt.err (!%p95_p4)
}
   0xb   :  { %s124_s12 = smov 128   ;;  %s125_s13 = smov 8  }
   0xc   :  { %20 = dma.hbm_to_vmem [thread:$0]  %s157_s0, 256, %s15_s10, [#allocation3], %s124_s12, %s124_s12, %s125_s13  }
   0xd   :  { %119 = dma.done.wait [#allocation3], 256  }
   0xe   :  { %120 = vsyncadd [#allocation3], 4294967040  ;;  %v26_v0 = vld [vmem:[#allocation2] sm:$0xff]  ;;  %v27_v1 = vld [vmem:[#allocation2 + $0x8] sm:$0xff]  ;;  %s126_s0 = smov [#allocation5]  }
   0xf   :  { %v29_v2 = vmul.f32 %v26_v0, %v26_v0  ;;  %v30_v3 = vmul.f32 %v27_v1, %v27_v1  ;;  %v70_v11 = vld [vmem:[%s158_s1] ss:$0 sm:$0xff]  ;;  %s58_s18 = sshll.u32 %s126_s0, 4  ;;  %s59_s18 = int_to_ptr.vmem [resolvable:$true] %s58_s18 }
  0x10   :  { %s99_s19 = scalar_lea.vmem %s59_s18, 256  ;;  %p104_p6 = scmp.lt.s32.totalorder %s59_s18, %s59_s18 }
  0x11   :  { %31 = vadd.xlane.f32.xlu0 %v29_v2  ;;  %p100_p5 = scmp.ne.s32.totalorder %s59_s18, %s99_s19  ;;  %p105_p7 = scmp.lt.s32.totalorder %s99_s19, %s99_s19 }
  0x13   :  { %p106_p8 = por %p105_p7, %p104_p6 }
  0x15   :  { %33 = vadd.xlane.f32.xlu0 %v30_v3  ;;  %p107_p9 = pnand %p106_p8, %p100_p5 }
  0x9a   :  { %v32_v4 = vpop.xlane.xlu0 %31 }
  0x9b   :  { %v35_v5 = vmul.f32 0.03125, %v32_v4 }
  0x9d   :  { %v37_v6 = vadd.f32 1e-05, %v35_v5 }
  0x9e   :  { %v34_v7 = vpop.xlane.xlu0 %33 }
  0x9f   :  { %75 = vrsqrt.f32 %v37_v6  ;;  %v36_v8 = vmul.f32 0.03125, %v34_v7 }
  0xa1   :  { %v38_v9 = vadd.f32 1e-05, %v36_v8 }
  0xa3   :  { %77 = vrsqrt.f32 %v38_v9 }
  0xac   :  { %v76_v10 = vpop.eup %75 }
  0xad   :  { %v41_v12 = vmul.f32 %v76_v10, %v26_v0 }
  0xaf   :  { %v49_v13 = vmul.f32 %v70_v11, %v41_v12 }
  0xb0   :  { %v78_v14 = vpop.eup %77 }
  0xb1   :  { %v42_v15 = vmul.f32 %v78_v14, %v27_v1  ;;  %51 = vst [vmem:[#allocation5] sm:$0xff] %v49_v13 }
  0xb3   :  { %v50_v16 = vmul.f32 %v70_v11, %v42_v15 }
  0xb5   :  { %52 = vst [vmem:[#allocation5 + $0x8] sm:$0xff] %v50_v16 }
  0xb6   :  { %110 = shalt.err (!%p107_p9)
}
  0xb7   :  { %64 = dma.vmem_to_hbm [thread:$0]  %s59_s18, 256, %s159_s2, [#allocation4], %s124_s12, %s124_s12, %s125_s13  }
  0xb8   :  { %121 = dma.done.wait [#allocation4], 256  }
  0xb9   :  { %122 = vsyncadd [#allocation4], 4294967040 }
  0xba   :  { %68 = vsyncpa [#allocation3], 1 }
  0xbb   :  { %69 = vsyncpa [#allocation4], 1 }

</bundles_post_ra>
